<compile_context>
chip_gen: v6e
topology: v6e:2x2x1
jax: 0.10.0
libtpu: 0.0.40
codegen_flags: <defaults>
</compile_context>

<pallas_src>
import functools

import jax
import jax.numpy as jnp
from jax.experimental import pallas as pl
from jax.experimental.pallas import tpu as pltpu


def _conv_embed_kernel(p_ref, w_ref, prm_ref, o_ref, *, n_ch, eps):
    # p_ref:   (K, TS)    patch columns for this (batch, spatial tile), compute dtype
    # w_ref:   (Cout, K)  flattened conv weight (resident across the grid)
    # prm_ref: (Cout, 3)  packed [bias | gamma | beta] columns, f32 (resident)
    # o_ref:   (Cout, TS) normalized embeddings, channel-major (NCHW slab)
    acc = jnp.dot(w_ref[...], p_ref[...],
                  preferred_element_type=jnp.float32)          # MXU -> (Cout, TS) f32

    prm = prm_ref[...].astype(jnp.float32)                     # (Cout, 3)
    bias, gamma, beta = prm[:, 0:1], prm[:, 1:2], prm[:, 2:3]  # (Cout, 1) each
    acc = acc + bias

    # LayerNorm over channels (rows).  One-pass stats: the two sublane
    # reductions are independent (no mean -> centered -> var serialization)
    # and no centered temporary is needed just to get the variance.
    inv_n = jnp.float32(1.0 / n_ch)
    mean = jnp.sum(acc, axis=0, keepdims=True) * inv_n               # (1, TS)
    msq = jnp.sum(acc * acc, axis=0, keepdims=True) * inv_n          # (1, TS)
    var = jnp.maximum(msq - mean * mean, 0.0)                        # cancellation guard
    inv_std = jax.lax.rsqrt(var + eps)                               # EUP
    o_ref[...] = ((acc - mean) * (inv_std * gamma) + beta).astype(o_ref.dtype)


def conv_embedder(x, weight, bias, gamma, beta, *, stride, padding,
                  compute_dtype=jnp.bfloat16):
    """x: (B, Cin, H, W) NCHW.  weight: (Cout, Cin, k, k).  Returns NCHW."""
    B, Cin, H, W = x.shape
    Cout, _, k, _ = weight.shape
    Ho = (H + 2 * padding - k) // stride + 1
    Wo = (W + 2 * padding - k) // stride + 1
    K = Cin * k * k
    Msp = Ho * Wo

    # --- patch extraction (no gather, no explicit pad, no transpose) ---
    # Output is (B, Cin*k*k, Ho, Wo) with feature order (cin, kh, kw), i.e.
    # exactly Conv2d's weight.reshape(Cout, Cin*k*k) contraction order.
    # TODO(synk): fuse extraction fully into the kernel (keep x in HBM via
    #   pl.ANY and manually DMA the k-row slab per output-row tile) to remove
    #   this remaining HBM round trip over the ~k^2/stride^2-expanded tensor.
    patches = jax.lax.conv_general_dilated_patches(
        x.astype(compute_dtype), (k, k), (stride, stride),
        [(padding, padding), (padding, padding)],
        precision=jax.lax.Precision.HIGHEST)
    patches = patches.reshape(B, K, Msp)            # contiguous view, no copy

    w_mat = weight.reshape(Cout, K).astype(compute_dtype)
    params = jnp.stack([bias, gamma, beta], axis=1).astype(jnp.float32)  # (Cout, 3)

    # Spatial tile: largest divisor of Ho*Wo that is a multiple of 128 lanes
    # (lane-dense stores) and <= 2048; otherwise take the whole row — the
    # per-batch slab K*Msp stays tiny next to VMEM for any realistic image.
    TS = Msp
    for cand in range(2048, 0, -128):
        if cand <= Msp and Msp % cand == 0:
            TS = cand
            break
    nsp = Msp // TS

    kernel = functools.partial(_conv_embed_kernel, n_ch=Cout, eps=1e-5)

    out = pl.pallas_call(
        kernel,
        out_shape=jax.ShapeDtypeStruct((B, Cout, Msp), x.dtype),
        grid=(B, nsp),
        in_specs=[
            # streamed patch slab; batch dim squeezed out of the kernel view
            pl.BlockSpec((None, K, TS), lambda b, j: (b, 0, j)),
            # resident weight and packed bias/gamma/beta (constant index maps)
            pl.BlockSpec((Cout, K), lambda b, j: (0, 0)),
            pl.BlockSpec((Cout, 3), lambda b, j: (0, 0)),
        ],
        out_specs=pl.BlockSpec((None, Cout, TS), lambda b, j: (b, 0, j)),
        compiler_params=pltpu.CompilerParams(
            # Every (b, j) writes a disjoint output tile -> fully parallel;
            # gives v7x's two TensorCores >= 2 steps (demo grid is (2, 1)).
            dimension_semantics=("parallel", "parallel"),
        ),
    )(patches, w_mat, params)

    # (B, Cout, Ho*Wo) -> (B, Cout, Ho, Wo): contiguous reshape, no transpose.
    return out.reshape(B, Cout, Ho, Wo)


def _reference(x, weight, bias, gamma, beta, *, stride, padding):
    y = jax.lax.conv_general_dilated(
        x, weight, (stride, stride), ((padding, padding), (padding, padding)),
        dimension_numbers=("NCHW", "OIHW", "NCHW"),
        precision=jax.lax.Precision.HIGHEST)
    y = y + bias[None, :, None, None]
    yt = jnp.transpose(y, (0, 2, 3, 1))
    mean = yt.mean(-1, keepdims=True)
    var = ((yt - mean) ** 2).mean(-1, keepdims=True)
    yn = (yt - mean) / jnp.sqrt(var + 1e-5) * gamma + beta
    return jnp.transpose(yn, (0, 3, 1, 2))


if __name__ == "__main__":
    # Small shapes consistent with the module:
    # dim_in=4, dim_out=32, patch_size=7, stride=4, padding=2, input 16x16.
    B, Cin, H, W = 2, 4, 16, 16
    Cout, k, stride, padding = 32, 7, 4, 2

    key = jax.random.PRNGKey(0)
    kx, kw, kb = jax.random.split(key, 3)
    x = jax.random.normal(kx, (B, Cin, H, W), dtype=jnp.float32)
    weight = jax.random.normal(kw, (Cout, Cin, k, k), dtype=jnp.float32) * 0.05
    bias = jax.random.normal(kb, (Cout,), dtype=jnp.float32) * 0.1
    gamma = jnp.ones((Cout,), dtype=jnp.float32)
    beta = jnp.zeros((Cout,), dtype=jnp.float32)

    ref = _reference(x, weight, bias, gamma, beta, stride=stride, padding=padding)

    # f32-compute path: tight check of the kernel math / layout / LN stats.
    out_f32 = conv_embedder(x, weight, bias, gamma, beta, stride=stride,
                            padding=padding, compute_dtype=jnp.float32)
    out_f32 = jax.block_until_ready(out_f32)
    assert out_f32.shape == ref.shape, (out_f32.shape, ref.shape)
    assert jnp.allclose(out_f32, ref, atol=2e-3, rtol=2e-3), \
        float(jnp.max(jnp.abs(out_f32 - ref)))

    # Default fast path: bf16 operands (halves streamed HBM bytes); LayerNorm
    # stays f32, so tolerance is modest.
    out = conv_embedder(x, weight, bias, gamma, beta, stride=stride, padding=padding)
    out = jax.block_until_ready(out)
    assert out.shape == ref.shape, (out.shape, ref.shape)
    assert jnp.allclose(out, ref, atol=5e-2, rtol=5e-2), \
        float(jnp.max(jnp.abs(out - ref)))

    print("KERNEL_OK")
</pallas_src>

<mosaic_0001>
module attributes {stable_mosaic.version = 11 : i64} {
  func.func @_conv_embed_kernel(%arg0: i32, %arg1: i32, %arg2: memref<1x196x16xf32, #tpu.memory_space<vmem>>, %arg3: memref<32x196xf32, #tpu.memory_space<vmem>>, %arg4: memref<32x3xf32, #tpu.memory_space<vmem>>, %arg5: memref<1x32x16xf32, #tpu.memory_space<vmem>>) attributes {dimension_semantics = [#tpu.dimension_semantics<parallel>, #tpu.dimension_semantics<parallel>], iteration_bounds = array<i64: 2, 1>, scalar_prefetch = 0 : i64, scratch_operands = 0 : i64, tpu.core_type = #tpu.core_type<tc>, window_params = [{transform_indices = @transform_0, window_bounds = array<i64: 1, 196, 16>}, {pipeline_mode = #tpu.pipeline_mode<synchronous>, transform_indices = @transform_1, window_bounds = array<i64: 32, 196>}, {pipeline_mode = #tpu.pipeline_mode<synchronous>, transform_indices = @transform_2, window_bounds = array<i64: 32, 3>}, {transform_indices = @transform_3, window_bounds = array<i64: 1, 32, 16>}]} {
    %c0 = arith.constant 0 : index
    %c0_0 = arith.constant 0 : index
    %0 = vector.load %arg3[%c0, %c0_0] : memref<32x196xf32, #tpu.memory_space<vmem>>, vector<32x196xf32>
    %c0_1 = arith.constant 0 : index
    %c0_2 = arith.constant 0 : index
    %c0_3 = arith.constant 0 : index
    %1 = vector.load %arg2[%c0_1, %c0_2, %c0_3] : memref<1x196x16xf32, #tpu.memory_space<vmem>>, vector<1x196x16xf32>
    %2 = vector.shape_cast %1 : vector<1x196x16xf32> to vector<196x16xf32>
    %cst = arith.constant dense<0.000000e+00> : vector<32x16xf32>
    %3 = tpu.matmul %0, %2, %cst {dimension_numbers = #tpu.dot_dimension_numbers<[1], [0], [0], [1], [0, 0, 1, 1], [], []>} : vector<32x196xf32>, vector<196x16xf32>, vector<32x16xf32> -> vector<32x16xf32>
    %c0_4 = arith.constant 0 : index
    %c0_5 = arith.constant 0 : index
    %4 = vector.load %arg4[%c0_4, %c0_5] : memref<32x3xf32, #tpu.memory_space<vmem>>, vector<32x3xf32>
    %5 = vector.extract_strided_slice %4 {offsets = [0, 0], sizes = [32, 1], strides = [1, 1]} : vector<32x3xf32> to vector<32x1xf32>
    %6 = vector.extract_strided_slice %4 {offsets = [0, 1], sizes = [32, 1], strides = [1, 1]} : vector<32x3xf32> to vector<32x1xf32>
    %7 = vector.extract_strided_slice %4 {offsets = [0, 2], sizes = [32, 1], strides = [1, 1]} : vector<32x3xf32> to vector<32x1xf32>
    %8 = vector.broadcast %5 : vector<32x1xf32> to vector<32x16xf32>
    %9 = arith.addf %3, %8 : vector<32x16xf32>
    %cst_6 = arith.constant dense<0.000000e+00> : vector<16xf32>
    %10 = vector.multi_reduction <add>, %9, %cst_6 [0] : vector<32x16xf32> to vector<16xf32>
    %11 = vector.shape_cast %10 : vector<16xf32> to vector<1x16xf32>
    %cst_7 = arith.constant 3.125000e-02 : f32
    %12 = vector.broadcast %cst_7 : f32 to vector<1x16xf32>
    %13 = arith.mulf %11, %12 : vector<1x16xf32>
    %14 = arith.mulf %9, %9 : vector<32x16xf32>
    %cst_8 = arith.constant dense<0.000000e+00> : vector<16xf32>
    %15 = vector.multi_reduction <add>, %14, %cst_8 [0] : vector<32x16xf32> to vector<16xf32>
    %16 = vector.shape_cast %15 : vector<16xf32> to vector<1x16xf32>
    %cst_9 = arith.constant 3.125000e-02 : f32
    %17 = vector.broadcast %cst_9 : f32 to vector<1x16xf32>
    %18 = arith.mulf %16, %17 : vector<1x16xf32>
    %19 = arith.mulf %13, %13 : vector<1x16xf32>
    %20 = arith.subf %18, %19 : vector<1x16xf32>
    %cst_10 = arith.constant 0.000000e+00 : f32
    %21 = vector.broadcast %cst_10 : f32 to vector<1x16xf32>
    %22 = arith.maximumf %20, %21 : vector<1x16xf32>
    %cst_11 = arith.constant 9.99999974E-6 : f32
    %23 = vector.broadcast %cst_11 : f32 to vector<1x16xf32>
    %24 = arith.addf %22, %23 : vector<1x16xf32>
    %25 = math.rsqrt %24 : vector<1x16xf32>
    %26 = vector.broadcast %13 : vector<1x16xf32> to vector<32x16xf32>
    %27 = arith.subf %9, %26 : vector<32x16xf32>
    %28 = vector.broadcast %25 : vector<1x16xf32> to vector<32x16xf32>
    %29 = vector.broadcast %6 : vector<32x1xf32> to vector<32x16xf32>
    %30 = arith.mulf %28, %29 : vector<32x16xf32>
    %31 = arith.mulf %27, %30 : vector<32x16xf32>
    %32 = vector.broadcast %7 : vector<32x1xf32> to vector<32x16xf32>
    %33 = arith.addf %31, %32 : vector<32x16xf32>
    %c0_12 = arith.constant 0 : index
    %c0_13 = arith.constant 0 : index
    %c0_14 = arith.constant 0 : index
    %34 = vector.load %arg5[%c0_12, %c0_13, %c0_14] : memref<1x32x16xf32, #tpu.memory_space<vmem>>, vector<1x32x16xf32>
    %35 = vector.shape_cast %34 : vector<1x32x16xf32> to vector<32x16xf32>
    %36 = vector.shape_cast %33 : vector<32x16xf32> to vector<1x32x16xf32>
    tpu.vector_store %arg5[%c0_12, %c0_13, %c0_14], %36 {strides = array<i32>} : memref<1x32x16xf32, #tpu.memory_space<vmem>>, vector<1x32x16xf32>,
    return
  }
  func.func @transform_0(%arg0: i32, %arg1: i32) -> (i32, i32, i32) {
    %c0_i32 = arith.constant 0 : i32
    %c0_i32_0 = arith.constant 0 : i32
    return %arg0, %c0_i32, %arg1 : i32, i32, i32
  }
  func.func @transform_1(%arg0: i32, %arg1: i32) -> (i32, i32) {
    %c0_i32 = arith.constant 0 : i32
    %c0_i32_0 = arith.constant 0 : i32
    %c0_i32_1 = arith.constant 0 : i32
    return %c0_i32, %c0_i32_0 : i32, i32
  }
  func.func @transform_2(%arg0: i32, %arg1: i32) -> (i32, i32) {
    %c0_i32 = arith.constant 0 : i32
    %c0_i32_0 = arith.constant 0 : i32
    %c0_i32_1 = arith.constant 0 : i32
    return %c0_i32, %c0_i32_0 : i32, i32
  }
  func.func @transform_3(%arg0: i32, %arg1: i32) -> (i32, i32, i32) {
    %c0_i32 = arith.constant 0 : i32
    %c0_i32_0 = arith.constant 0 : i32
    return %arg0, %c0_i32, %arg1 : i32, i32, i32
  }
}

</mosaic_0001>

<bundles_post_ra>
// kernel: tpu_custom_call.1
= control target key start
LH: loop header
LB: loop body
LE: loop exit
PB: predicated region body
PF: predicated region fallthrough
CT: control target
= control target key end

     0   :  { %s685_s12 = smov 0   ;;  %s687_s13 = smov 0   ;;  %s873_s0 = inlined_call_operand.vmem [shape: f32[2,196,16], index: 0, kind: input, shape index: {}]   ;;  %s874_s1 = inlined_call_operand.vmem [shape: f32[32,196], index: 1, kind: input, shape index: {}]   ;;  %s875_s2 = inlined_call_operand.vmem [shape: f32[32,3], index: 2, kind: input, shape index: {}]   ;;  %s876_s3 = inlined_call_operand.vmem [shape: f32[2,32,16], index: 3, kind: output, shape index: {}]  }
   0x1   :  { %s689_s14 = smov 0  }
   0x2 LB: > { %s25_s15 = sadd.s32 1, %s655_s13  ;;  %p538_p0 = scmp.ge.s32.totalorder %s659_s14, 1  ;;  %s659_s14 = sphi %s689_s14, %s13_s14   ;;  %s655_s13 = sphi %s687_s13, %s878_s13   ;;  %s651_s12 = sphi %s685_s12, %s877_s12  }
   0x3   : > { %p27_p1 = scmp.ge.s32.totalorder %s25_s15, 2  ;;  %p156_p2 = scmp.lt.s32.totalorder %s659_s14, 3 }
   0x5   : > { %s880_s15 = smov (%p27_p1, %s25_s15), 0  ;;  %p157_p3 = pnand %p538_p0, %p156_p2 }
   0x6   : > { %p186_p4 = scmp.lt.s32.totalorder (!%p157_p3), %s651_s12, 1 }
   0x7   : > { %160 = sbr.rel (%p157_p3) target bundleno = 316 (0x13c), region = 32 }
   0xc   : > { %v203_v0 = vld [vmem:[%s874_s1 + $0x8] sm:$0xff]  ;;  %vm259_vm0 = vcmask 556032   ;;  %v661_v2 = vmov 0.0   ;;  %s882_s12 = smov (!%p186_p4, %s651_s12), 1  ;;  %v662_v3 = vmov 0   ;;  %v718_v4 = vld [vmem:[%s875_s2] sm:$0xff] }
   0xd   : > { %v207_v1 = vld [vmem:[%s874_s1 + $0x28] sm:$0xff]  ;;  %276 = vmatprep.subr.mxu0 %v661_v2  ;;  %550 = vmatprep.subr.mxu1 %v661_v2  ;;  %v723_v5 = vld [vmem:[%s875_s2 + $0x10] sm:$0xff]  ;;  %s600_s24 = smul.u32 200, %s882_s12  ;;  %vm272_vm1 = vcmask 1043456   ;;  %v202_v31 = vld [vmem:[%s874_s1] sm:$0xff]  ;;  %v663_v39 = vmov 1  }
   0xe   : > { %543 = vmatprep.mubr.msk.f32.mxu0 %vm259_vm0, %v203_v0  ;;  %545 = vmatprep.mubr.msk.f32.mxu1 %vm259_vm0, %v207_v1  ;;  %v206_v32 = vld [vmem:[%s874_s1 + $0x20] sm:$0xff]  ;;  %v205_v33 = vld [vmem:[%s874_s1 + $0x18] sm:$0xff]  ;;  %v236_v35 = vld [vmem:[%s875_s2 + $0x8] sm:$0xff]  ;;  %v664_v40 = vmov 2   ;;  %vm361_vm2 = vcmask 130048   ;;  %s549_s21 = sshll.u32 %s882_s12, 5 }
   0xf   : > { %629 = vset.pattern.permute.xlu0 %v662_v3  ;;  %630 = vset.pattern.permute.xlu1 %v662_v3  ;;  %s731_s27 = scalar_lea.vmem %s873_s0, %s600_s24  ;;  %v209_v34 = vld [vmem:[%s874_s1 + $0x38] sm:$0xff]  ;;  %v204_v37 = vld [vmem:[%s874_s1 + $0x10] sm:$0xff]  ;;  %s201_s24 = scalar_lea.vmem %s876_s3, %s549_s21 }
  0x10   : > { %241 = vperm.xlu0 %629, %v718_v4   ;;  %251 = vperm.xlu1 %630, %v723_v5   ;;  %v225_v6 = vld [vmem:[%s731_s27 + $0x78] sm:$0xff]  ;;  %v224_v7 = vld [vmem:[%s731_s27 + $0x70] sm:$0xff]  ;;  %v223_v8 = vld [vmem:[%s731_s27 + $0x68] sm:$0xff] }
  0x11   : > { %277 = vmatpush1.msra.mxu0 %v225_v6  ;;  %575 = vmatpush1.msra.mxu1 %v225_v6  ;;  %v222_v9 = vld [vmem:[%s731_s27 + $0x60] sm:$0xff]  ;;  %v221_v10 = vld [vmem:[%s731_s27 + $0x58] sm:$0xff]  ;;  %v220_v11 = vld [vmem:[%s731_s27 + $0x50] sm:$0xff] }
  0x12   : > { %278 = vmatprep.subr.mxu0 %v661_v2  ;;  %551 = vmatprep.subr.mxu1 %v661_v2  ;;  %v219_v12 = vld [vmem:[%s731_s27 + $0x48] sm:$0xff]  ;;  %v218_v13 = vld [vmem:[%s731_s27 + $0x40] sm:$0xff]  ;;  %v217_v14 = vld [vmem:[%s731_s27 + $0x38] sm:$0xff] }
  0x13   : > { %279 = vmatpush1.msra.mxu0 %v224_v7  ;;  %576 = vmatpush1.msra.mxu1 %v224_v7  ;;  %v216_v15 = vld [vmem:[%s731_s27 + $0x30] sm:$0xff]  ;;  %v215_v16 = vld [vmem:[%s731_s27 + $0x28] sm:$0xff]  ;;  %v214_v17 = vld [vmem:[%s731_s27 + $0x20] sm:$0xff] }
  0x14   : > { %280 = vmatprep.subr.mxu0 %v661_v2  ;;  %552 = vmatprep.subr.mxu1 %v661_v2  ;;  %v213_v18 = vld [vmem:[%s731_s27 + $0x18] sm:$0xff]  ;;  %v212_v19 = vld [vmem:[%s731_s27 + $0x10] sm:$0xff]  ;;  %v211_v20 = vld [vmem:[%s731_s27 + $0x8] sm:$0xff] }
  0x15   : > { %281 = vmatpush1.msra.mxu0 %v223_v8  ;;  %577 = vmatpush1.msra.mxu1 %v223_v8  ;;  %v210_v21 = vld [vmem:[%s731_s27] sm:$0xff]  ;;  %v233_v23 = vld [vmem:[%s731_s27 + $0xb8] sm:$0xff]  ;;  %v232_v24 = vld [vmem:[%s731_s27 + $0xb0] sm:$0xff] }
  0x16   : > { %282 = vmatprep.subr.mxu0 %v661_v2  ;;  %553 = vmatprep.subr.mxu1 %v661_v2  ;;  %v234_v22 = vld [vmem:[%s731_s27 + $0xc0] sm:$0xf]  ;;  %v231_v25 = vld [vmem:[%s731_s27 + $0xa8] sm:$0xff]  ;;  %v229_v27 = vld [vmem:[%s731_s27 + $0x98] sm:$0xff] }
  0x17   : > { %283 = vmatpush1.msra.mxu0 %v222_v9  ;;  %578 = vmatpush1.msra.mxu1 %v222_v9  ;;  %v230_v26 = vld [vmem:[%s731_s27 + $0xa0] sm:$0xff]  ;;  %v228_v28 = vld [vmem:[%s731_s27 + $0x90] sm:$0xff]  ;;  %v227_v29 = vld [vmem:[%s731_s27 + $0x88] sm:$0xff] }
  0x18   : > { %284 = vmatprep.subr.mxu0 %v661_v2  ;;  %554 = vmatprep.subr.mxu1 %v661_v2  ;;  %v226_v30 = vld [vmem:[%s731_s27 + $0x80] sm:$0xff]  ;;  %v238_v36 = vld [vmem:[%s875_s2 + $0x18] sm:$0xff]  ;;  %v208_v38 = vld [vmem:[%s874_s1 + $0x30] sm:$0xff] }
  0x19   : > { %285 = vmatpush1.msra.mxu0 %v221_v10  ;;  %579 = vmatpush1.msra.mxu1 %v221_v10 }
  0x1a   : > { %286 = vmatprep.subr.mxu0 %v661_v2  ;;  %555 = vmatprep.subr.mxu1 %v661_v2 }
  0x1b   : > { %287 = vmatpush1.msra.mxu0 %v220_v11  ;;  %580 = vmatpush1.msra.mxu1 %v220_v11 }
  0x1c   : > { %288 = vmatprep.subr.mxu0 %v661_v2  ;;  %556 = vmatprep.subr.mxu1 %v661_v2 }
  0x1d   : > { %289 = vmatpush1.msra.mxu0 %v219_v12  ;;  %581 = vmatpush1.msra.mxu1 %v219_v12 }
  0x1e   : > { %290 = vmatprep.subr.mxu0 %v661_v2  ;;  %557 = vmatprep.subr.mxu1 %v661_v2 }
  0x1f   : > { %291 = vmatpush1.msra.mxu0 %v218_v13  ;;  %582 = vmatpush1.msra.mxu1 %v218_v13 }
  0x20   : > { %292 = vmatprep.subr.mxu0 %v661_v2  ;;  %558 = vmatprep.subr.mxu1 %v661_v2 }
  0x21   : > { %293 = vmatpush1.msra.mxu0 %v217_v14  ;;  %583 = vmatpush1.msra.mxu1 %v217_v14 }
  0x22   : > { %294 = vmatprep.subr.mxu0 %v661_v2  ;;  %559 = vmatprep.subr.mxu1 %v661_v2 }
  0x23   : > { %295 = vmatpush1.msra.mxu0 %v216_v15  ;;  %584 = vmatpush1.msra.mxu1 %v216_v15 }
  0x24   : > { %296 = vmatprep.subr.mxu0 %v661_v2  ;;  %560 = vmatprep.subr.mxu1 %v661_v2 }
  0x25   : > { %297 = vmatpush1.msra.mxu0 %v215_v16  ;;  %585 = vmatpush1.msra.mxu1 %v215_v16 }
  0x26   : > { %298 = vmatprep.subr.mxu0 %v661_v2  ;;  %561 = vmatprep.subr.mxu1 %v661_v2 }
  0x27   : > { %299 = vmatpush1.msra.mxu0 %v214_v17  ;;  %586 = vmatpush1.msra.mxu1 %v214_v17 }
  0x28   : > { %300 = vmatprep.subr.mxu0 %v661_v2  ;;  %562 = vmatprep.subr.mxu1 %v661_v2 }
  0x29   : > { %301 = vmatpush1.msra.mxu0 %v213_v18  ;;  %587 = vmatpush1.msra.mxu1 %v213_v18 }
  0x2a   : > { %302 = vmatprep.subr.mxu0 %v661_v2  ;;  %563 = vmatprep.subr.mxu1 %v661_v2 }
  0x2b   : > { %303 = vmatpush1.msra.mxu0 %v212_v19  ;;  %588 = vmatpush1.msra.mxu1 %v212_v19 }
  0x2c   : > { %304 = vmatprep.subr.mxu0 %v661_v2  ;;  %564 = vmatprep.subr.mxu1 %v661_v2 }
  0x2d   : > { %305 = vmatpush1.msra.mxu0 %v211_v20  ;;  %589 = vmatpush1.msra.mxu1 %v211_v20 }
  0x2e   : > { %306 = vmatprep.subr.mxu0 %v661_v2  ;;  %565 = vmatprep.subr.mxu1 %v661_v2 }
  0x2f   : > { %307 = vmatpush1.msra.mxu0 %v210_v21  ;;  %590 = vmatpush1.msra.mxu1 %v210_v21 }
  0x30   : > { %322 = vmatprep.subr.mxu0 %v661_v2  ;;  %566 = vmatprep.subr.mxu1 %v661_v2 }
  0x31   : > { %542 = vmatpush2.msk.msra.mxu0 %vm272_vm1, %v234_v22  ;;  %591 = vmatpush2.msk.msra.mxu1 %vm272_vm1, %v234_v22 }
  0x32   : > { %324 = vmatprep.subr.mxu0 %v661_v2  ;;  %567 = vmatprep.subr.mxu1 %v661_v2 }
  0x33   : > { %325 = vmatpush2.msra.mxu0 %v233_v23  ;;  %592 = vmatpush2.msra.mxu1 %v233_v23 }
  0x34   : > { %326 = vmatprep.subr.mxu0 %v661_v2  ;;  %568 = vmatprep.subr.mxu1 %v661_v2 }
  0x35   : > { %327 = vmatpush2.msra.mxu0 %v232_v24  ;;  %593 = vmatpush2.msra.mxu1 %v232_v24 }
  0x36   : > { %328 = vmatprep.subr.mxu0 %v661_v2  ;;  %569 = vmatprep.subr.mxu1 %v661_v2 }
  0x37   : > { %329 = vmatpush2.msra.mxu0 %v231_v25  ;;  %594 = vmatpush2.msra.mxu1 %v231_v25 }
  0x38   : > { %330 = vmatprep.subr.mxu0 %v661_v2  ;;  %570 = vmatprep.subr.mxu1 %v661_v2 }
  0x39   : > { %331 = vmatpush2.msra.mxu0 %v230_v26  ;;  %595 = vmatpush2.msra.mxu1 %v230_v26 }
  0x3a   : > { %332 = vmatprep.subr.mxu0 %v661_v2  ;;  %571 = vmatprep.subr.mxu1 %v661_v2 }
  0x3b   : > { %333 = vmatpush2.msra.mxu0 %v229_v27  ;;  %596 = vmatpush2.msra.mxu1 %v229_v27 }
  0x3c   : > { %334 = vmatprep.subr.mxu0 %v661_v2  ;;  %572 = vmatprep.subr.mxu1 %v661_v2 }
  0x3d   : > { %335 = vmatpush2.msra.mxu0 %v228_v28  ;;  %597 = vmatpush2.msra.mxu1 %v228_v28 }
  0x3e   : > { %336 = vmatprep.subr.mxu0 %v661_v2  ;;  %573 = vmatprep.subr.mxu1 %v661_v2 }
  0x3f   : > { %337 = vmatpush2.msra.mxu0 %v227_v29  ;;  %598 = vmatpush2.msra.mxu1 %v227_v29 }
  0x40   : > { %338 = vmatprep.subr.mxu0 %v661_v2  ;;  %574 = vmatprep.subr.mxu1 %v661_v2 }
  0x41   : > { %339 = vmatpush2.msra.mxu0 %v226_v30  ;;  %599 = vmatpush2.msra.mxu1 %v226_v30 }
  0x42   : > { %341 = vmatmul.mubr.f32.vlgmr.msra.gmra.mxu0 %v202_v31  ;;  %351 = vmatmul.mubr.f32.vlgmr.msra.gmra.mxu1 %v206_v32 }
  0x43   : > { %544 = vmatprep.mubr.msk.f32.mxu0 %vm259_vm0, %v205_v33  ;;  %546 = vmatprep.mubr.msk.f32.mxu1 %vm259_vm0, %v209_v34 }
  0x44   : > { %246 = vperm.xlu0 %629, %v236_v35   ;;  %256 = vperm.xlu1 %630, %v238_v36  }
  0x46   : > { %346 = vmatmul.mubr.f32.gmra.mxu0 %v204_v37  ;;  %356 = vmatmul.mubr.f32.gmra.mxu1 %v208_v38 }
  0x48   : > { %632 = vset.pattern.permute.xlu1 %v663_v39  ;;  %631 = vset.pattern.permute.xlu0 %v663_v39 }
  0x49   : > { %408 = vperm.xlu1 %632, %v236_v35   ;;  %404 = vperm.xlu0 %631, %v718_v4  }
  0x4d   : > { %412 = vperm.xlu1 %632, %v723_v5   ;;  %416 = vperm.xlu0 %631, %v238_v36  }
  0x51   : > { %633 = vset.pattern.permute.xlu1 %v664_v40  ;;  %634 = vset.pattern.permute.xlu0 %v664_v40 }
  0x52   : > { %428 = vperm.xlu1 %633, %v718_v4   ;;  %432 = vperm.xlu0 %634, %v236_v35  }
  0x56   : > { %436 = vperm.xlu1 %633, %v723_v5  }
  0x5a   : > { %440 = vperm.xlu1 %633, %v238_v36  }
  0x8b   : > { %v252_v41 = vpop.permute.xlu1 %251  ;;  %v242_v42 = vpop.permute.xlu0 %241 }
  0xbf   : > { %v257_v46 = vpop.permute.xlu1 %256  ;;  %v247_v49 = vpop.permute.xlu0 %246 }
  0xc4   : > { %v409_v26 = vpop.permute.xlu1 %408  ;;  %v405_v32 = vpop.permute.xlu0 %404 }
  0xc8   : > { %v413_v30 = vpop.permute.xlu1 %412  ;;  %v417_v34 = vpop.permute.xlu0 %416 }
  0xcd   : > { %v429_v31 = vpop.permute.xlu1 %428 }
  0xd1   : > { %v437_v33 = vpop.permute.xlu1 %436 }
 0x102   : > { %v342_v43 = vpop.f32.mrf.mxu0  ;;  %v352_v44 = vpop.f32.mrf.mxu1 }
 0x103   : > { %v836_v45 = vadd.f32 %v342_v43, %v242_v42  ;;  %v838_v50 = vadd.f32 %v352_v44, %v252_v41  ;;  %v433_v44 = vpop.permute.xlu0 %432 }
 0x104   : > { %v344_v47 = vpop.f32.mrf.mxu0  ;;  %v354_v48 = vpop.f32.mrf.mxu1 }
 0x105   : > { %v376_v53 = vmul.f32 %v836_v45, %v836_v45  ;;  %v362_v58 = vsel %vm361_vm2, %v836_v45, 0.0  ;;  %v378_v59 = vmul.f32 %v838_v50, %v838_v50  ;;  %v365_v0 = vsel %vm361_vm2, %v838_v50, 0.0 }
 0x106   : > { %v347_v51 = vpop.f32.mrf.mxu0  ;;  %v357_v52 = vpop.f32.mrf.mxu1 }
 0x107   : > { %v348_v54 = vadd.f32 %v347_v51, %v247_v49  ;;  %v358_v55 = vadd.f32 %v357_v52, %v257_v46  ;;  %v380_v63 = vsel %vm361_vm2, %v376_v53, 0.0  ;;  %v383_v5 = vsel %vm361_vm2, %v378_v59, 0.0  ;;  %v441_v51 = vpop.permute.xlu1 %440 }
 0x108   : > { %v349_v56 = vpop.f32.mrf.mxu0  ;;  %v359_v57 = vpop.f32.mrf.mxu1 }
 0x109   : > { %v363_v60 = vsel %vm361_vm2, %v348_v54, 0.0  ;;  %v377_v61 = vmul.f32 %v348_v54, %v348_v54  ;;  %v379_v2 = vmul.f32 %v358_v55, %v358_v55  ;;  %v367_v6 = vsel %vm361_vm2, %v358_v55, 0.0 }
 0x10a   : > { %v364_v62 = vadd.f32 %v363_v60, %v362_v58 }
 0x10b   : > { %v381_v1 = vsel %vm361_vm2, %v377_v61, 0.0  ;;  %v385_v9 = vsel %vm361_vm2, %v379_v2, 0.0 }
 0x10c   : > { %v382_v3 = vadd.f32 %v381_v1, %v380_v63  ;;  %v366_v4 = vadd.f32 %v365_v0, %v364_v62 }
 0x10e   : > { %v368_v7 = vadd.f32 %v367_v6, %v366_v4  ;;  %v384_v8 = vadd.f32 %v383_v5, %v382_v3 }
 0x110   : > { %v369_v10 = vrot.slane %v368_v7, 4  ;;  %v386_v11 = vadd.f32 %v385_v9, %v384_v8 }
 0x112   : > { %v370_v12 = vadd.f32 %v369_v10, %v368_v7  ;;  %v387_v13 = vrot.slane %v386_v11, 4 }
 0x114   : > { %v371_v14 = vrot.slane %v370_v12, 2  ;;  %v388_v15 = vadd.f32 %v387_v13, %v386_v11 }
 0x116   : > { %v372_v16 = vadd.f32 %v371_v14, %v370_v12  ;;  %v389_v17 = vrot.slane %v388_v15, 2 }
 0x118   : > { %v373_v18 = vrot.slane %v372_v16, 1  ;;  %v390_v19 = vadd.f32 %v389_v17, %v388_v15 }
 0x11a   : > { %v374_v20 = vadd.f32 %v373_v18, %v372_v16  ;;  %v391_v21 = vrot.slane %v390_v19, 1 }
 0x11c   : > { %v375_v22 = vmul.f32 0.03125, %v374_v20  ;;  %v392_v23 = vadd.f32 %v391_v21, %v390_v19 }
 0x11e   : > { %v393_v24 = vmul.f32 0.03125, %v392_v23  ;;  %v394_v25 = vmul.f32 %v375_v22, %v375_v22  ;;  %v399_v36 = vsub.f32 %v836_v45, %v375_v22  ;;  %v401_v37 = vsub.f32 %v838_v50, %v375_v22 }
 0x11f   : > { %v402_v38 = vsub.f32 %v358_v55, %v375_v22  ;;  %v400_v39 = vsub.f32 %v348_v54, %v375_v22 }
 0x120   : > { %v395_v27 = vsub.f32 %v393_v24, %v394_v25 }
 0x122   : > { %v396_v28 = vmax.f32 %v395_v27, 0.0 }
 0x124   : > { %v397_v29 = vadd.f32 1e-05, %v396_v28 }
 0x126   : > { %635 = vrsqrt.f32 %v397_v29 }
 0x133   : > { %v636_v35 = vpop.eup %635 }
 0x134   : > { %v420_v40 = vmul.f32 %v636_v35, %v409_v26  ;;  %v421_v41 = vmul.f32 %v636_v35, %v413_v30  ;;  %v419_v42 = vmul.f32 %v636_v35, %v405_v32  ;;  %v422_v43 = vmul.f32 %v636_v35, %v417_v34 }
 0x136   : > { %v423_v46 = vmul.f32 %v419_v42, %v399_v36  ;;  %v425_v47 = vmul.f32 %v421_v41, %v401_v37  ;;  %v426_v48 = vmul.f32 %v422_v43, %v402_v38  ;;  %v424_v49 = vmul.f32 %v420_v40, %v400_v39 }
 0x138   : > { %v443_v45 = vadd.f32 %v429_v31, %v423_v46  ;;  %v445_v52 = vadd.f32 %v437_v33, %v425_v47  ;;  %v446_v50 = vadd.f32 %v441_v51, %v426_v48  ;;  %v444_v53 = vadd.f32 %v433_v44, %v424_v49 }
 0x13a   : > { %447 = vst.msk [vmem:[%s201_s24] sm:$0xff] %vm361_vm2, %v443_v45  ;;  %449 = vst.msk [vmem:[%s201_s24 + $0x10] sm:$0xff] %vm361_vm2, %v445_v52 }
 0x13b   : > { %450 = vst.msk [vmem:[%s201_s24 + $0x18] sm:$0xff] %vm361_vm2, %v446_v50  ;;  %448 = vst.msk [vmem:[%s201_s24 + $0x8] sm:$0xff] %vm361_vm2, %v444_v53 }
 0x13c PF: > { %s13_s14 = sadd.s32 1, %s659_s14   ;;  %s877_s12 = smov %s655_s13 }
 0x13d   : > { %p10_p5 = scmp.ge.s32.totalorder %s13_s14, 4   ;;  %s878_s13 = smov %s880_s15 }
 0x13f   :  { %12 = sbr.rel (!%p10_p5) target bundleno = 2 (0x2), region = 62 }

</bundles_post_ra>
